<compile_context>
chip_gen: v5e
topology: v5e:2x2
jax: 0.10.0
libtpu: 0.0.40
codegen_flags: <defaults>
</compile_context>

<pallas_src>
import jax
import jax.numpy as jnp
from jax.experimental import pallas as pl
from jax.experimental.pallas import tpu as pltpu


def agent_kernel(xin_ref, vb_ref, w2_ref, head_ref, out_ref):
    # xin: (tile, 2) f32  columns [xs | xn]
    # vb : (8, H)    f32  rows    [w_seed@w1 ; w_node@w1 ; b1 ; b2 ; zero pad]
    xin = xin_ref[...]
    vb = vb_ref[...]

    # Layer 1 (folded): z1 = xs*(w_seed@w1) + xn*(w_node@w1) + b1   -- exact, f32 on VPU.
    z1 = xin[:, 0:1] * vb[0:1, :] + xin[:, 1:2] * vb[1:2, :] + vb[2:3, :]
    h1 = z1 * jax.nn.sigmoid(z1)                                   # Swish, f32 VPU/EUP

    # Layer 2: Linear(H, H) + Swish. bf16 operands, f32 accumulation on the MXU.
    z2 = jnp.dot(h1.astype(jnp.bfloat16), w2_ref[...],
                 preferred_element_type=jnp.float32) + vb[3:4, :]
    h2 = z2 * jax.nn.sigmoid(z2)

    # Fused score heads -> narrow (tile, 8) f32 block: [node_score | stop_0 | stop_1 | pad].
    out_ref[...] = jnp.dot(h2.astype(jnp.bfloat16), head_ref[...],
                           preferred_element_type=jnp.float32)


def _round_up(a, b):
    return (a + b - 1) // b * b


def _choose_tile(n, tile_n, min_grid):
    """Largest tile <= tile_n such that the grid has >= min_grid steps (when n allows).

    min_grid=2 keeps both v7x TensorCores fed via the "parallel" grid axis; tiles are
    always a multiple of 8 sublanes.
    """
    target = max(8, _round_up(pl.cdiv(n, min_grid), 8))
    return max(8, min(_round_up(tile_n, 8), target))


def agent_forward_core(x_seeds, x_nodes, params, tile_n=4096, min_grid=2):
    """Runs the Pallas kernel over all N nodes.

    Returns:
      node_scores: (N,)   node_score_layer(h)
      ss_proj:     (N, 2) h @ w_ss  (per-node stopping projection; its mean over an
                          episode equals stopping_score_layer(mean(h)) exactly).
    """
    N = int(x_seeds.shape[0])
    H = params["w_seed"].shape[1]

    # --- host-side exact algebraic folds / packing ----------------------------------
    vs = params["w_seed"] @ params["w1"]                 # (1, H)  exact fold (linear)
    vn = params["w_node"] @ params["w1"]                 # (1, H)
    vb = jnp.zeros((8, H), jnp.float32)
    vb = (vb.at[0].set(vs[0]).at[1].set(vn[0])
            .at[2].set(params["b1"][0]).at[3].set(params["b2"][0]))
    w2_bf16 = params["w2"].astype(jnp.bfloat16)          # (H, H)
    head_w = jnp.concatenate(                            # (H, 8): [ns | ss(2) | zero pad]
        [params["w_ns"], params["w_ss"], jnp.zeros((H, 5), jnp.float32)],
        axis=1).astype(jnp.bfloat16)

    # --- tiling over N ----------------------------------------------------------------
    tile = _choose_tile(N, tile_n, min_grid)
    n_pad = _round_up(N, tile)

    xin = jnp.zeros((n_pad, 2), jnp.float32)
    xin = xin.at[:N, 0].set(x_seeds.astype(jnp.float32))
    xin = xin.at[:N, 1].set(x_nodes.astype(jnp.float32))

    act = lambda i: (i, 0)     # activation blocks march over N
    res = lambda i: (0, 0)     # weights/biases resident across the grid

    out = pl.pallas_call(
        agent_kernel,
        out_shape=jax.ShapeDtypeStruct((n_pad, 8), jnp.float32),
        grid_spec=pltpu.PrefetchScalarGridSpec(
            num_scalar_prefetch=0,
            grid=(n_pad // tile,),
            in_specs=[
                pl.BlockSpec((tile, 2), act),    # [xs | xn]
                pl.BlockSpec((8, H), res),       # [vs; vn; b1; b2; pad]
                pl.BlockSpec((H, H), res),       # w2 (bf16)
                pl.BlockSpec((H, 8), res),       # fused head (bf16)
            ],
            out_specs=pl.BlockSpec((tile, 8), act),
        ),
        compiler_params=pltpu.CompilerParams(
            dimension_semantics=("parallel",),   # shard the N-grid across v7x's 2 TCs
            vmem_limit_bytes=32 << 20,           # explicit: v5e scoped default is only 16 MiB
        ),
    )(xin, vb, w2_bf16, head_w)

    node_scores = out[:N, 0]       # column 0: node_score_layer(h)
    ss_proj = out[:N, 1:3]         # columns 1..2: h @ w_ss
    return node_scores, ss_proj


def agent_forward(x_seeds, x_nodes, indptr, params):
    """Full forward pass matching the PyTorch module. Returns a list of logits arrays."""
    node_scores, ss_proj = agent_forward_core(x_seeds, x_nodes, params)

    for startpoint, endpoint, _ in indptr:
        if startpoint == endpoint:
            raise ValueError("Finished Episode!")

    # Batched stopping head: per-episode mean of ss_proj via one cumulative sum
    # (mean is linear, so mean(h[s:e]) @ w_ss == mean(ss_proj[s:e])), then one
    # batched log_softmax over all episodes.
    starts = jnp.array([s for s, _, _ in indptr], jnp.int32)
    ends = jnp.array([e for _, e, _ in indptr], jnp.int32)
    csum = jnp.concatenate(
        [jnp.zeros((1, 2), jnp.float32), jnp.cumsum(ss_proj, axis=0)], axis=0)
    seg_mean = (csum[ends] - csum[starts]) / (ends - starts)[:, None].astype(jnp.float32)
    stopping_logits = jax.nn.log_softmax(seg_mean, axis=1)            # (E, 2)

    # TODO(synk): the ragged per-episode node log_softmax + concat (variable-length list
    # output, static Python indptr) stays host-side; a padded/segment formulation could
    # batch it as well for very large episode counts.
    batch = []
    for i, (startpoint, endpoint, candidate_endpoint) in enumerate(indptr):
        node_logits = jax.nn.log_softmax(node_scores[startpoint:candidate_endpoint], axis=0)
        logits = jnp.concatenate(
            [node_logits + stopping_logits[i, 0], stopping_logits[i, 1:]], axis=0)
        batch.append(logits)
    return batch


def init_params(hidden_size, key):
    """Deterministic parameter init. Weights stored pre-transposed as (in, out)."""
    k1, k2, k3, k4, k5, k6 = jax.random.split(key, 6)
    scale = 0.1
    params = {
        "w_seed": scale * jax.random.normal(k1, (1, hidden_size), jnp.float32),
        "w_node": scale * jax.random.normal(k2, (1, hidden_size), jnp.float32),
        "w1": scale * jax.random.normal(k3, (hidden_size, hidden_size), jnp.float32),
        "b1": scale * jax.random.normal(k4, (1, hidden_size), jnp.float32),
        "w2": scale * jax.random.normal(k5, (hidden_size, hidden_size), jnp.float32),
        "b2": scale * jax.random.normal(k6, (1, hidden_size), jnp.float32),
        # node_score_layer and stopping_score_layer are zero-initialized in the module.
        "w_ns": jnp.zeros((hidden_size, 1), jnp.float32),
        "w_ss": jnp.zeros((hidden_size, 2), jnp.float32),
    }
    return params


if __name__ == "__main__":
    key = jax.random.PRNGKey(0)
    hidden_size = 32   # Not padded to 128: the kernel is writeback/step-overhead bound, not MXU bound.
    N = 16             # total number of candidate nodes across the batch

    kx, kn, kp = jax.random.split(key, 3)
    x_seeds = jax.random.normal(kx, (N,), jnp.float32)
    x_nodes = jax.random.normal(kn, (N,), jnp.float32)
    # Two episodes: (startpoint, endpoint, candidate_endpoint)
    indptr = [(0, 6, 5), (6, 16, 14)]

    params = init_params(hidden_size, kp)

    batch_logits = agent_forward(x_seeds, x_nodes, indptr, params)
    for lg in batch_logits:
        jax.block_until_ready(lg)

    # basic sanity: each output has (candidate_endpoint - startpoint) + 1 entries
    assert batch_logits[0].shape == (5 + 1,)
    assert batch_logits[1].shape == (8 + 1,)
    print("KERNEL_OK")
</pallas_src>

<mosaic_0001>
module attributes {stable_mosaic.version = 11 : i64} {
  func.func @agent_kernel(%arg0: i32, %arg1: memref<8x2xf32, #tpu.memory_space<vmem>>, %arg2: memref<8x32xf32, #tpu.memory_space<vmem>>, %arg3: memref<32x32xbf16, #tpu.memory_space<vmem>>, %arg4: memref<32x8xbf16, #tpu.memory_space<vmem>>, %arg5: memref<8x8xf32, #tpu.memory_space<vmem>>) attributes {dimension_semantics = [#tpu.dimension_semantics<parallel>], iteration_bounds = array<i64: 2>, scalar_prefetch = 0 : i64, scratch_operands = 0 : i64, tpu.core_type = #tpu.core_type<tc>, window_params = [{transform_indices = @transform_0, window_bounds = array<i64: 8, 2>}, {pipeline_mode = #tpu.pipeline_mode<synchronous>, transform_indices = @transform_1, window_bounds = array<i64: 8, 32>}, {pipeline_mode = #tpu.pipeline_mode<synchronous>, transform_indices = @transform_2, window_bounds = array<i64: 32, 32>}, {pipeline_mode = #tpu.pipeline_mode<synchronous>, transform_indices = @transform_3, window_bounds = array<i64: 32, 8>}, {transform_indices = @transform_4, window_bounds = array<i64: 8, 8>}]} {
    %c0 = arith.constant 0 : index
    %c0_0 = arith.constant 0 : index
    %0 = vector.load %arg1[%c0, %c0_0] : memref<8x2xf32, #tpu.memory_space<vmem>>, vector<8x2xf32>
    %c0_1 = arith.constant 0 : index
    %c0_2 = arith.constant 0 : index
    %1 = vector.load %arg2[%c0_1, %c0_2] : memref<8x32xf32, #tpu.memory_space<vmem>>, vector<8x32xf32>
    %2 = vector.extract_strided_slice %0 {offsets = [0, 0], sizes = [8, 1], strides = [1, 1]} : vector<8x2xf32> to vector<8x1xf32>
    %3 = vector.extract_strided_slice %1 {offsets = [0, 0], sizes = [1, 32], strides = [1, 1]} : vector<8x32xf32> to vector<1x32xf32>
    %4 = vector.broadcast %2 : vector<8x1xf32> to vector<8x32xf32>
    %5 = vector.broadcast %3 : vector<1x32xf32> to vector<8x32xf32>
    %6 = arith.mulf %4, %5 : vector<8x32xf32>
    %7 = vector.extract_strided_slice %0 {offsets = [0, 1], sizes = [8, 1], strides = [1, 1]} : vector<8x2xf32> to vector<8x1xf32>
    %8 = vector.extract_strided_slice %1 {offsets = [1, 0], sizes = [1, 32], strides = [1, 1]} : vector<8x32xf32> to vector<1x32xf32>
    %9 = vector.broadcast %7 : vector<8x1xf32> to vector<8x32xf32>
    %10 = vector.broadcast %8 : vector<1x32xf32> to vector<8x32xf32>
    %11 = arith.mulf %9, %10 : vector<8x32xf32>
    %12 = arith.addf %6, %11 : vector<8x32xf32>
    %13 = vector.extract_strided_slice %1 {offsets = [2, 0], sizes = [1, 32], strides = [1, 1]} : vector<8x32xf32> to vector<1x32xf32>
    %14 = vector.broadcast %13 : vector<1x32xf32> to vector<8x32xf32>
    %15 = arith.addf %12, %14 : vector<8x32xf32>
    %16 = arith.negf %15 : vector<8x32xf32>
    %17 = math.exp %16 : vector<8x32xf32>
    %cst = arith.constant 1.000000e+00 : f32
    %18 = vector.broadcast %cst : f32 to vector<8x32xf32>
    %19 = arith.addf %18, %17 : vector<8x32xf32>
    %20 = arith.divf %18, %19 : vector<8x32xf32>
    %21 = arith.mulf %15, %20 : vector<8x32xf32>
    %22 = arith.truncf %21 : vector<8x32xf32> to vector<8x32xbf16>
    %c0_3 = arith.constant 0 : index
    %c0_4 = arith.constant 0 : index
    %23 = vector.load %arg3[%c0_3, %c0_4] : memref<32x32xbf16, #tpu.memory_space<vmem>>, vector<32x32xbf16>
    %cst_5 = arith.constant dense<0.000000e+00> : vector<8x32xf32>
    %24 = tpu.matmul %22, %23, %cst_5 {dimension_numbers = #tpu.dot_dimension_numbers<[1], [0], [0], [1], [0, 0, 1, 1], [], []>} : vector<8x32xbf16>, vector<32x32xbf16>, vector<8x32xf32> -> vector<8x32xf32>
    %25 = vector.extract_strided_slice %1 {offsets = [3, 0], sizes = [1, 32], strides = [1, 1]} : vector<8x32xf32> to vector<1x32xf32>
    %26 = vector.broadcast %25 : vector<1x32xf32> to vector<8x32xf32>
    %27 = arith.addf %24, %26 : vector<8x32xf32>
    %28 = arith.negf %27 : vector<8x32xf32>
    %29 = math.exp %28 : vector<8x32xf32>
    %cst_6 = arith.constant 1.000000e+00 : f32
    %30 = vector.broadcast %cst_6 : f32 to vector<8x32xf32>
    %31 = arith.addf %30, %29 : vector<8x32xf32>
    %32 = arith.divf %30, %31 : vector<8x32xf32>
    %33 = arith.mulf %27, %32 : vector<8x32xf32>
    %34 = arith.truncf %33 : vector<8x32xf32> to vector<8x32xbf16>
    %c0_7 = arith.constant 0 : index
    %c0_8 = arith.constant 0 : index
    %35 = vector.load %arg4[%c0_7, %c0_8] : memref<32x8xbf16, #tpu.memory_space<vmem>>, vector<32x8xbf16>
    %cst_9 = arith.constant dense<0.000000e+00> : vector<8x8xf32>
    %36 = tpu.matmul %34, %35, %cst_9 {dimension_numbers = #tpu.dot_dimension_numbers<[1], [0], [0], [1], [0, 0, 1, 1], [], []>} : vector<8x32xbf16>, vector<32x8xbf16>, vector<8x8xf32> -> vector<8x8xf32>
    %c0_10 = arith.constant 0 : index
    %c0_11 = arith.constant 0 : index
    %37 = vector.load %arg5[%c0_10, %c0_11] : memref<8x8xf32, #tpu.memory_space<vmem>>, vector<8x8xf32>
    tpu.vector_store %arg5[%c0_10, %c0_11], %36 {strides = array<i32>} : memref<8x8xf32, #tpu.memory_space<vmem>>, vector<8x8xf32>,
    return
  }
  func.func @transform_0(%arg0: i32) -> (i32, i32) {
    %c0_i32 = arith.constant 0 : i32
    %c0_i32_0 = arith.constant 0 : i32
    return %arg0, %c0_i32 : i32, i32
  }
  func.func @transform_1(%arg0: i32) -> (i32, i32) {
    %c0_i32 = arith.constant 0 : i32
    %c0_i32_0 = arith.constant 0 : i32
    %c0_i32_1 = arith.constant 0 : i32
    return %c0_i32, %c0_i32_0 : i32, i32
  }
  func.func @transform_2(%arg0: i32) -> (i32, i32) {
    %c0_i32 = arith.constant 0 : i32
    %c0_i32_0 = arith.constant 0 : i32
    %c0_i32_1 = arith.constant 0 : i32
    return %c0_i32, %c0_i32_0 : i32, i32
  }
  func.func @transform_3(%arg0: i32) -> (i32, i32) {
    %c0_i32 = arith.constant 0 : i32
    %c0_i32_0 = arith.constant 0 : i32
    %c0_i32_1 = arith.constant 0 : i32
    return %c0_i32, %c0_i32_0 : i32, i32
  }
  func.func @transform_4(%arg0: i32) -> (i32, i32) {
    %c0_i32 = arith.constant 0 : i32
    %c0_i32_0 = arith.constant 0 : i32
    return %arg0, %c0_i32 : i32, i32
  }
}

</mosaic_0001>

<bundles_post_ra>
// kernel: tpu_custom_call.1
= control target key start
LH: loop header
LB: loop body
LE: loop exit
PB: predicated region body
PF: predicated region fallthrough
CT: control target
= control target key end

     0   :  { %s463_s15 = smov 0   ;;  %s504_s0 = inlined_call_operand.vmem [shape: f32[16,2], index: 0, kind: input, shape index: {}]   ;;  %s505_s1 = inlined_call_operand.vmem [shape: f32[8,32], index: 1, kind: input, shape index: {}]   ;;  %s506_s2 = inlined_call_operand.vmem [shape: bf16[32,32], index: 2, kind: input, shape index: {}]   ;;  %s507_s3 = inlined_call_operand.vmem [shape: bf16[32,8], index: 3, kind: input, shape index: {}]   ;;  %s508_s4 = inlined_call_operand.vmem [shape: f32[16,8], index: 4, kind: output, shape index: {}]  }
   0x1 LB: > { %s375_s16 = sadd.s32 4294967295, %s434_s15   ;;  %p379_p0 = scmp.ge.s32.totalorder %s434_s15, 1  ;;  %s434_s15 = sphi %s463_s15, %s14_s15  }
   0x2   : > { %p161_p1 = scmp.lt.s32.totalorder %s434_s15, 3 }
   0x4   : > { %p162_p2 = pnand %p379_p0, %p161_p1 }
   0x5   : > { %p185_p3 = scmp.lt.s32.totalorder (!%p162_p2), %s375_s16, 1 }
   0x6   : > { %165 = sbr.rel (%p162_p2) target bundleno = 471 (0x1d7), region = 36 }
   0xb   : > { %v436_v0 = vmov 0   ;;  %s510_s16 = smov (!%p185_p3, %s375_s16), 1  ;;  %v437_v2 = vmov 1   ;;  %v405_v3 = vld [vmem:[%s506_s2 + $0x8] sm:$0xff]  ;;  %v404_v4 = vld [vmem:[%s506_s2] sm:$0xff]  ;;  %vm250_vm4 = vcmask 261120  }
   0xc   : > { %418 = vset.pattern.permute.xlu0 %v436_v0  ;;  %s380_s17 = sshll.u32 %s510_s16, 3  ;;  %260 = vmatpush.bf16.msra.mxu0 %v405_v3  ;;  %v195_v6 = vld [vmem:[%s505_s1] sm:$0xff]  ;;  %v407_v30 = vld [vmem:[%s507_s3 + $0x8] sm:$0xff]  ;;  %vm320_vm9 = vcmask 64512  }
   0xd   : > { %s188_s20 = scalar_lea.vmem %s504_s0, %s380_s17  ;;  %v201_v7 = vperm.slane %v195_v6, 0  ;;  %v207_v8 = vperm.slane %v195_v6, 1  ;;  %v210_v11 = vperm.slane %v195_v6, 2  ;;  %313 = vmatpush.bf16.msra.mxu1 %v407_v30  ;;  %v237_v31 = vperm.slane %v195_v6, 3  ;;  %v406_v32 = vld [vmem:[%s507_s3] sm:$0xff]  ;;  %s192_s7 = scalar_lea.vmem %s508_s4, %s380_s17 }
   0xe   : > { %v194_v1 = vld [vmem:[%s188_s20] sm:$0xff] }
   0xf   : > { %198 = vperm.xlu0 %418, %v194_v1  }
  0x10   : > { %261 = vmatpush.bf16.msra.mxu0 %v404_v4 }
  0x11   : > { %314 = vmatpush.bf16.msra.mxu1 %v406_v32 }
  0x17   : > { %419 = vset.pattern.permute.xlu0 %v437_v2 }
  0x18   : > { %204 = vperm.xlu0 %419, %v194_v1  }
  0x81   : > { %v199_v5 = vpop.permute.xlu0 %198 }
  0x82   : > { %v202_v10 = vmul.f32 %v201_v7, %v199_v5 }
  0x8a   : > { %v205_v9 = vpop.permute.xlu0 %204 }
  0x8b   : > { %v208_v12 = vmul.f32 %v207_v8, %v205_v9 }
  0x8d   : > { %v209_v13 = vadd.f32 %v208_v12, %v202_v10 }
  0x8f   : > { %v211_v14 = vadd.f32 %v210_v11, %v209_v13 }
  0x91   : > { %v382_v15 = vmul.f32 -1.442695, %v211_v14 }
  0x93   : > { %420 = vpow2.f32 %v382_v15 }
  0x99   : > { %v421_v16 = vpop.eup %420 }
  0x9a   : > { %v215_v17 = vadd.f32 1.0, %v421_v16 }
  0x9c   : > { %422 = vrcp.f32 %v215_v17  ;;  %v227_v21 = vand.u32 2147483648, %v215_v17  ;;  %v225_v23 = vand.u32 2147483647, %v215_v17  ;;  %vm221_vm1 = vweird.f32 %v215_v17 }
  0x9e   : > { %v228_v25 = vor.u32 1.1754944e-38, %v227_v21  ;;  %vm226_vm3 = vcmp.eq.f32.partialorder %v225_v23, 8.507059e+37 }
  0xa2   : > { %v423_v18 = vpop.eup %422 }
  0xa3   : > { %v217_v19 = vmul.f32 %v423_v18, %v215_v17  ;;  %vm222_vm0 = vweird.f32 %v423_v18 }
  0xa4   : > { %vm223_vm2 = vmor %vm221_vm1, %vm222_vm0 }
  0xa5   : > { %v218_v20 = vsub.f32 1.0, %v217_v19 }
  0xa7   : > { %v219_v22 = vmul.f32 %v423_v18, %v218_v20 }
  0xa9   : > { %v220_v24 = vadd.f32 %v423_v18, %v219_v22 }
  0xab   : > { %v224_v26 = vsel %vm223_vm2, %v423_v18, %v220_v24 }
  0xac   : > { %v229_v27 = vsel %vm226_vm3, %v228_v25, %v224_v26 }
  0xad   : > { %v231_v28 = vmul.f32 %v229_v27, %v211_v14 }
  0xaf   : > { %v232_v29 = vpack.c.bf16 %v231_v28, %v231_v28 }
  0xb1   : > { %391 = vmatmul.msk.bf16.vlgmr.msra.gmra.mxu0 %vm250_vm4, %v232_v29 }
 0x12e   : > { %v263_v33 = vpop.f32.mrf.mxu0 }
 0x12f   : > { %v264_v34 = vadd.f32 %v263_v33, %v237_v31 }
 0x131   : > { %v392_v35 = vmul.f32 -1.442695, %v264_v34 }
 0x133   : > { %424 = vpow2.f32 %v392_v35 }
 0x136   : > { %v265_v36 = vpop.f32.mrf.mxu0 }
 0x139   : > { %v425_v37 = vpop.eup %424 }
 0x13a   : > { %v270_v38 = vadd.f32 1.0, %v425_v37 }
 0x13c   : > { %426 = vrcp.f32 %v270_v38  ;;  %v282_v42 = vand.u32 2147483648, %v270_v38  ;;  %v280_v44 = vand.u32 2147483647, %v270_v38  ;;  %vm276_vm6 = vweird.f32 %v270_v38 }
 0x13e   : > { %v283_v46 = vor.u32 1.1754944e-38, %v282_v42  ;;  %vm281_vm8 = vcmp.eq.f32.partialorder %v280_v44, 8.507059e+37 }
 0x142   : > { %v427_v39 = vpop.eup %426 }
 0x143   : > { %v272_v40 = vmul.f32 %v427_v39, %v270_v38  ;;  %vm277_vm5 = vweird.f32 %v427_v39 }
 0x144   : > { %vm278_vm7 = vmor %vm276_vm6, %vm277_vm5 }
 0x145   : > { %v273_v41 = vsub.f32 1.0, %v272_v40 }
 0x147   : > { %v274_v43 = vmul.f32 %v427_v39, %v273_v41 }
 0x149   : > { %v275_v45 = vadd.f32 %v427_v39, %v274_v43 }
 0x14b   : > { %v279_v47 = vsel %vm278_vm7, %v427_v39, %v275_v45 }
 0x14c   : > { %v284_v48 = vsel %vm281_vm8, %v283_v46, %v279_v47 }
 0x14d   : > { %v286_v49 = vmul.f32 %v284_v48, %v264_v34 }
 0x14f   : > { %v287_v50 = vpack.c.bf16 %v286_v49, %v286_v49 }
 0x151   : > { %401 = vmatmul.msk.bf16.vlgmr.msra.gmra.mxu1 %vm250_vm4, %v287_v50 }
 0x1ce   : > { %v316_v51 = vpop.f32.mrf.mxu1 }
 0x1cf   : > { %321 = vst.msk [vmem:[%s192_s7] sm:$0xff] %vm320_vm9, %v316_v51 }
 0x1d6   : > { %v318_v52 = vpop.f32.mrf.mxu1 }
 0x1d7 PF: > { %s14_s15 = sadd.s32 1, %s434_s15  }
 0x1d8   : > { %p11_p4 = scmp.ge.s32.totalorder %s14_s15, 4  }
 0x1da   :  { %13 = sbr.rel (!%p11_p4) target bundleno = 1 (0x1), region = 66 }

</bundles_post_ra>
